<compile_context>
chip_gen: v5e
topology: v5e:2x2
jax: 0.10.0
libtpu: 0.0.40
codegen_flags: <defaults>
</compile_context>

<pallas_src>
import functools
import math

import jax
import jax.numpy as jnp
from jax.experimental import pallas as pl
from jax.experimental.pallas import tpu as pltpu


# ----------------------------------------------------------------------------
# Kernel
# ----------------------------------------------------------------------------
def _mlp_kernel(n_layers, compute_dtype, x_ref, *refs):
    """Fused MLP on transposed activations.

    refs = (w0, b0, w1, b1, ..., w_{n-1}, b_{n-1}, out_ref).

    x_ref:   (M, tb)      compute_dtype   (batch on lanes)
    w_i:     (out_i, in_i) compute_dtype  (PyTorch nn.Linear layout)
    b_i:     (out_i, 1)   float32
    out_ref: (M, tb)      out dtype

    Each layer: acc = W_i @ h + b_i  (f32 accumulation on the MXU), ReLU for
    all but the last layer.  Intermediates never touch HBM.
    """
    out_ref = refs[-1]
    params = refs[:-1]
    h = x_ref[...]                                        # (in_0, tb)
    for i in range(n_layers):
        w = params[2 * i][...]                            # (out_i, in_i)
        b = params[2 * i + 1][...]                        # (out_i, 1) f32
        acc = jnp.dot(w, h, preferred_element_type=jnp.float32) + b
        if i < n_layers - 1:
            h = jnp.maximum(acc, 0.0).astype(compute_dtype)   # ReLU -> MXU dtype
        else:
            h = acc                                           # final layer stays f32
    out_ref[...] = h.astype(out_ref.dtype)


# ----------------------------------------------------------------------------
# One-time capability probe: does this JAX/Mosaic accept pipeline_mode=
# pl.Buffered(1) on a pallas_call BlockSpec?  Cached; AOT lower+compile only
# (no execution), so it is cheap and never runs inside the hot path.
# ----------------------------------------------------------------------------
_BUFFERED1_OK = None


def _probe_kernel(c_ref, x_ref, o_ref):
    o_ref[...] = x_ref[...] + c_ref[...]


def _buffered1_supported():
    global _BUFFERED1_OK
    if _BUFFERED1_OK is None:
        try:
            fn = pl.pallas_call(
                _probe_kernel,
                out_shape=jax.ShapeDtypeStruct((16, 128), jnp.float32),
                grid=(2,),
                in_specs=[
                    pl.BlockSpec((8, 128), lambda i: (0, 0),
                                 pipeline_mode=pl.Buffered(1)),   # replicated
                    pl.BlockSpec((8, 128), lambda i: (i, 0)),     # tiled
                ],
                out_specs=pl.BlockSpec((8, 128), lambda i: (i, 0)),
            )
            jax.jit(fn).lower(
                jax.ShapeDtypeStruct((8, 128), jnp.float32),
                jax.ShapeDtypeStruct((16, 128), jnp.float32),
            ).compile()
            _BUFFERED1_OK = True
        except Exception:
            # Deliberately broad: the probe kernel is trivial, so any failure
            # means the Buffered(1) feature is unavailable in this build.
            _BUFFERED1_OK = False
    return _BUFFERED1_OK


# ----------------------------------------------------------------------------
# Hardware query + tile sizing
# ----------------------------------------------------------------------------
def _tpu_vmem_capacity_bytes():
    try:
        info = pltpu.get_tpu_info()
        cap = getattr(info, "vmem_capacity_bytes", None)
        if cap:
            return int(cap)
    except Exception:
        pass
    return 64 * 1024 * 1024   # conservative default (v7x per-TC VMEM)


def _choose_batch_tile(batch, dims, compute_itemsize, out_itemsize,
                       param_vmem_bytes, vmem_budget_bytes, two_tensorcores):
    """Largest 128-lane-aligned batch tile whose working set fits the budget."""
    in_dim, out_dim = dims[0], dims[-1]
    widest = max(dims)
    tb = 128
    for cand in (8192, 4096, 2048, 1024, 512, 256, 128):
        act = 2 * cand * in_dim * compute_itemsize     # x^T tile, double-buffered
        act += 2 * cand * out_dim * out_itemsize       # out^T tile, double-buffered
        act += 3 * cand * widest * 4                   # in-flight f32 intermediates
        if param_vmem_bytes + act <= vmem_budget_bytes:
            tb = cand
            break
    # Never pad the batch by more than one lane-tile.
    batch_aligned = -(-batch // 128) * 128
    tb = min(tb, batch_aligned)
    # Only on dual-TensorCore parts (v7x) is it worth forcing >= 2 grid steps
    # (megacore split of the "parallel" batch axis).  On single-TC v5e/v6e the
    # grid is a serial loop: take the biggest tile that fits.
    if two_tensorcores and batch > 128:
        half = -(-batch // 2)
        half_aligned = -(-half // 128) * 128
        tb = min(tb, max(128, half_aligned))
    return max(128, tb)


# ----------------------------------------------------------------------------
# Forward wrapper
# ----------------------------------------------------------------------------
def autoencoder_forward(x, weights, biases, *, tb=None,
                        compute_dtype=jnp.bfloat16, out_dtype=None,
                        vmem_budget_bytes=None, vmem_limit_bytes=None):
    """Fused autoencoder forward pass.

    x:       (B, M) float32, batch-major (same as PyTorch)
    weights: list of (out_i, in_i) float32 (native PyTorch nn.Linear layout)
    biases:  list of (out_i,)      float32
    Returns: (B, M) in out_dtype (default: x.dtype).
    """
    B, M = x.shape
    n_layers = len(weights)
    assert int(weights[0].shape[1]) == M, "first layer input dim must equal M"
    assert int(weights[-1].shape[0]) == M, "autoencoder output dim must equal M"

    out_dtype = x.dtype if out_dtype is None else jnp.dtype(out_dtype)
    cbytes = jnp.dtype(compute_dtype).itemsize
    obytes = jnp.dtype(out_dtype).itemsize

    # Feature-major (transposed) activations: lanes = batch.
    xT = x.T.astype(compute_dtype)                            # (M, B)

    params = []
    for w, b in zip(weights, biases):
        params.append(w.astype(compute_dtype))                # (out, in)  bf16
        params.append(b.reshape(-1, 1).astype(jnp.float32))   # (out, 1)   f32

    buffered1 = _buffered1_supported()
    param_bytes = sum(int(p.size) * p.dtype.itemsize for p in params)
    # Single-buffered params (Buffered(1)) hold one VMEM copy; fallback path is
    # double-buffered by the pipeline.
    param_vmem = param_bytes if buffered1 else 2 * param_bytes

    cap = _tpu_vmem_capacity_bytes()
    two_cores = cap < 96 * 1024 * 1024        # 64 MiB/TC => v7x (2 TensorCores)
    if vmem_budget_bytes is None:
        vmem_budget_bytes = (40 << 20) if two_cores else (96 << 20)
    if vmem_limit_bytes is None:
        # Leave headroom under the physical capacity for Mosaic scratch /
        # pipeline metadata: ~52 MiB on v7x, 112 MiB on v5e/v6e.
        vmem_limit_bytes = min(cap - (12 << 20), 112 << 20)

    dims = [int(w.shape[1]) for w in weights] + [int(weights[-1].shape[0])]
    if tb is None:
        tb = _choose_batch_tile(B, dims, cbytes, obytes, param_vmem,
                                vmem_budget_bytes, two_cores)
    tb = max(128, (int(tb) // 128) * 128)     # lane alignment (batch on lanes)

    grid_b = pl.cdiv(B, tb)
    b_pad = grid_b * tb
    if b_pad != B:
        xT = jnp.pad(xT, ((0, 0), (0, b_pad - B)))

    flops = 2 * b_pad * sum(int(w.shape[0]) * int(w.shape[1]) for w in weights)
    bytes_accessed = b_pad * M * cbytes + param_bytes + b_pad * M * obytes
    cost = pl.CostEstimate(flops=flops, transcendentals=0,
                           bytes_accessed=bytes_accessed)

    kernel = functools.partial(_mlp_kernel, n_layers, compute_dtype)

    # x^T tiled over batch lanes; params replicated (constant index_map),
    # single-buffered when the installed JAX supports it.
    in_specs = [pl.BlockSpec((M, tb), lambda i: (0, i))]
    for p in params:
        if buffered1:
            in_specs.append(pl.BlockSpec(p.shape, lambda i: (0, 0),
                                         pipeline_mode=pl.Buffered(1)))
        else:
            in_specs.append(pl.BlockSpec(p.shape, lambda i: (0, 0)))

    outT = pl.pallas_call(
        kernel,
        out_shape=jax.ShapeDtypeStruct((M, b_pad), out_dtype),
        grid_spec=pltpu.PrefetchScalarGridSpec(
            num_scalar_prefetch=0,
            grid=(grid_b,),
            in_specs=in_specs,
            out_specs=pl.BlockSpec((M, tb), lambda i: (0, i)),
        ),
        compiler_params=pltpu.CompilerParams(
            dimension_semantics=("parallel",),
            vmem_limit_bytes=int(vmem_limit_bytes)),
        cost_estimate=cost,
    )(xT, *params)

    out = outT[:, :B] if b_pad != B else outT
    return out.T                                              # back to (B, M)


# ----------------------------------------------------------------------------
# Parameter init + pure-JAX reference (mirrors the PyTorch module)
# ----------------------------------------------------------------------------
def init_params(key, layer_shapes):
    """PyTorch-Linear-style init (uniform +/- 1/sqrt(fan_in)), native layout."""
    weights, biases = [], []
    for in_dim, out_dim in zip(layer_shapes[:-1], layer_shapes[1:]):
        key, kw, kb = jax.random.split(key, 3)
        bound = 1.0 / math.sqrt(in_dim)
        w = jax.random.uniform(kw, (out_dim, in_dim), jnp.float32, -bound, bound)
        b = jax.random.uniform(kb, (out_dim,), jnp.float32, -bound, bound)
        weights.append(w)                     # (out, in)  -- same as nn.Linear
        biases.append(b)                      # (out,)
    return weights, biases


def reference_forward(x, weights, biases, compute_dtype=jnp.float32):
    """Plain-JAX reference mirroring the PyTorch forward.

    compute_dtype=bf16 reproduces the kernel's cast points (MXU operands in
    bf16, f32 accumulation); compute_dtype=f32 is the exact PyTorch math.
    """
    h = x
    n = len(weights)
    for i in range(n):
        acc = jnp.dot(h.astype(compute_dtype),
                      weights[i].T.astype(compute_dtype),
                      preferred_element_type=jnp.float32) + biases[i]
        h = jnp.maximum(acc, 0.0) if i < n - 1 else acc
    return h


if __name__ == "__main__":
    # Small, module-consistent shapes:
    #   M=16, encoder_hidden=[32], K=8, decoder_hidden=[32]
    M = 16
    K = 8
    encoder_hidden = [32]
    decoder_hidden = [32]
    layer_shapes = [M] + encoder_hidden + [K] + decoder_hidden + [M]

    B = 100   # deliberately NOT a multiple of the lane tile -> exercises padding

    key = jax.random.PRNGKey(0)
    key, kx = jax.random.split(key)
    x = jax.random.normal(kx, (B, M), jnp.float32)

    weights, biases = init_params(key, layer_shapes)

    out = autoencoder_forward(x, weights, biases)   # bf16 MXU operands, f32 accum
    out = jax.block_until_ready(out)
    assert out.shape == (B, M)
    assert out.dtype == x.dtype

    # Reference with the kernel's exact cast points (bf16 operands, f32 accum).
    ref_matched = reference_forward(x, weights, biases, compute_dtype=jnp.bfloat16)
    assert jnp.allclose(out, ref_matched, atol=1e-2, rtol=1e-2)

    # Full-f32 PyTorch-style reference; looser tolerance because the kernel
    # feeds the MXU bf16 operands.
    ref_f32 = reference_forward(x, weights, biases, compute_dtype=jnp.float32)
    assert jnp.allclose(out, ref_f32, atol=5e-2, rtol=5e-2)

    print("KERNEL_OK")
</pallas_src>

<mosaic_0001>
module attributes {stable_mosaic.version = 11 : i64} {
  func.func @_mlp_kernel(%arg0: i32, %arg1: memref<16x128xbf16, #tpu.memory_space<vmem>>, %arg2: memref<32x16xbf16, #tpu.memory_space<vmem>>, %arg3: memref<32x1xf32, #tpu.memory_space<vmem>>, %arg4: memref<8x32xbf16, #tpu.memory_space<vmem>>, %arg5: memref<8x1xf32, #tpu.memory_space<vmem>>, %arg6: memref<32x8xbf16, #tpu.memory_space<vmem>>, %arg7: memref<32x1xf32, #tpu.memory_space<vmem>>, %arg8: memref<16x32xbf16, #tpu.memory_space<vmem>>, %arg9: memref<16x1xf32, #tpu.memory_space<vmem>>, %arg10: memref<16x128xf32, #tpu.memory_space<vmem>>) attributes {dimension_semantics = [#tpu.dimension_semantics<parallel>], iteration_bounds = array<i64: 1>, scalar_prefetch = 0 : i64, scratch_operands = 0 : i64, tpu.core_type = #tpu.core_type<tc>, window_params = [{transform_indices = @transform_0, window_bounds = array<i64: 16, 128>}, {pipeline_mode = #tpu.pipeline_mode<synchronous>, transform_indices = @transform_1, window_bounds = array<i64: 32, 16>}, {pipeline_mode = #tpu.pipeline_mode<synchronous>, transform_indices = @transform_2, window_bounds = array<i64: 32, 1>}, {pipeline_mode = #tpu.pipeline_mode<synchronous>, transform_indices = @transform_3, window_bounds = array<i64: 8, 32>}, {pipeline_mode = #tpu.pipeline_mode<synchronous>, transform_indices = @transform_4, window_bounds = array<i64: 8, 1>}, {pipeline_mode = #tpu.pipeline_mode<synchronous>, transform_indices = @transform_5, window_bounds = array<i64: 32, 8>}, {pipeline_mode = #tpu.pipeline_mode<synchronous>, transform_indices = @transform_6, window_bounds = array<i64: 32, 1>}, {pipeline_mode = #tpu.pipeline_mode<synchronous>, transform_indices = @transform_7, window_bounds = array<i64: 16, 32>}, {pipeline_mode = #tpu.pipeline_mode<synchronous>, transform_indices = @transform_8, window_bounds = array<i64: 16, 1>}, {transform_indices = @transform_9, window_bounds = array<i64: 16, 128>}]} {
    %c0 = arith.constant 0 : index
    %c0_0 = arith.constant 0 : index
    %0 = vector.load %arg1[%c0, %c0_0] : memref<16x128xbf16, #tpu.memory_space<vmem>>, vector<16x128xbf16>
    %c0_1 = arith.constant 0 : index
    %c0_2 = arith.constant 0 : index
    %1 = vector.load %arg2[%c0_1, %c0_2] : memref<32x16xbf16, #tpu.memory_space<vmem>>, vector<32x16xbf16>
    %c0_3 = arith.constant 0 : index
    %c0_4 = arith.constant 0 : index
    %2 = vector.load %arg3[%c0_3, %c0_4] : memref<32x1xf32, #tpu.memory_space<vmem>>, vector<32x1xf32>
    %cst = arith.constant dense<0.000000e+00> : vector<32x128xf32>
    %3 = tpu.matmul %1, %0, %cst {dimension_numbers = #tpu.dot_dimension_numbers<[1], [0], [0], [1], [0, 0, 1, 1], [], []>} : vector<32x16xbf16>, vector<16x128xbf16>, vector<32x128xf32> -> vector<32x128xf32>
    %4 = vector.broadcast %2 : vector<32x1xf32> to vector<32x128xf32>
    %5 = arith.addf %3, %4 : vector<32x128xf32>
    %cst_5 = arith.constant 0.000000e+00 : f32
    %6 = vector.broadcast %cst_5 : f32 to vector<32x128xf32>
    %7 = arith.maximumf %5, %6 : vector<32x128xf32>
    %8 = arith.truncf %7 : vector<32x128xf32> to vector<32x128xbf16>
    %c0_6 = arith.constant 0 : index
    %c0_7 = arith.constant 0 : index
    %9 = vector.load %arg4[%c0_6, %c0_7] : memref<8x32xbf16, #tpu.memory_space<vmem>>, vector<8x32xbf16>
    %c0_8 = arith.constant 0 : index
    %c0_9 = arith.constant 0 : index
    %10 = vector.load %arg5[%c0_8, %c0_9] : memref<8x1xf32, #tpu.memory_space<vmem>>, vector<8x1xf32>
    %cst_10 = arith.constant dense<0.000000e+00> : vector<8x128xf32>
    %11 = tpu.matmul %9, %8, %cst_10 {dimension_numbers = #tpu.dot_dimension_numbers<[1], [0], [0], [1], [0, 0, 1, 1], [], []>} : vector<8x32xbf16>, vector<32x128xbf16>, vector<8x128xf32> -> vector<8x128xf32>
    %12 = vector.broadcast %10 : vector<8x1xf32> to vector<8x128xf32>
    %13 = arith.addf %11, %12 : vector<8x128xf32>
    %cst_11 = arith.constant 0.000000e+00 : f32
    %14 = vector.broadcast %cst_11 : f32 to vector<8x128xf32>
    %15 = arith.maximumf %13, %14 : vector<8x128xf32>
    %16 = arith.truncf %15 : vector<8x128xf32> to vector<8x128xbf16>
    %c0_12 = arith.constant 0 : index
    %c0_13 = arith.constant 0 : index
    %17 = vector.load %arg6[%c0_12, %c0_13] : memref<32x8xbf16, #tpu.memory_space<vmem>>, vector<32x8xbf16>
    %c0_14 = arith.constant 0 : index
    %c0_15 = arith.constant 0 : index
    %18 = vector.load %arg7[%c0_14, %c0_15] : memref<32x1xf32, #tpu.memory_space<vmem>>, vector<32x1xf32>
    %cst_16 = arith.constant dense<0.000000e+00> : vector<32x128xf32>
    %19 = tpu.matmul %17, %16, %cst_16 {dimension_numbers = #tpu.dot_dimension_numbers<[1], [0], [0], [1], [0, 0, 1, 1], [], []>} : vector<32x8xbf16>, vector<8x128xbf16>, vector<32x128xf32> -> vector<32x128xf32>
    %20 = vector.broadcast %18 : vector<32x1xf32> to vector<32x128xf32>
    %21 = arith.addf %19, %20 : vector<32x128xf32>
    %cst_17 = arith.constant 0.000000e+00 : f32
    %22 = vector.broadcast %cst_17 : f32 to vector<32x128xf32>
    %23 = arith.maximumf %21, %22 : vector<32x128xf32>
    %24 = arith.truncf %23 : vector<32x128xf32> to vector<32x128xbf16>
    %c0_18 = arith.constant 0 : index
    %c0_19 = arith.constant 0 : index
    %25 = vector.load %arg8[%c0_18, %c0_19] : memref<16x32xbf16, #tpu.memory_space<vmem>>, vector<16x32xbf16>
    %c0_20 = arith.constant 0 : index
    %c0_21 = arith.constant 0 : index
    %26 = vector.load %arg9[%c0_20, %c0_21] : memref<16x1xf32, #tpu.memory_space<vmem>>, vector<16x1xf32>
    %cst_22 = arith.constant dense<0.000000e+00> : vector<16x128xf32>
    %27 = tpu.matmul %25, %24, %cst_22 {dimension_numbers = #tpu.dot_dimension_numbers<[1], [0], [0], [1], [0, 0, 1, 1], [], []>} : vector<16x32xbf16>, vector<32x128xbf16>, vector<16x128xf32> -> vector<16x128xf32>
    %28 = vector.broadcast %26 : vector<16x1xf32> to vector<16x128xf32>
    %29 = arith.addf %27, %28 : vector<16x128xf32>
    %c0_23 = arith.constant 0 : index
    %c0_24 = arith.constant 0 : index
    %30 = vector.load %arg10[%c0_23, %c0_24] : memref<16x128xf32, #tpu.memory_space<vmem>>, vector<16x128xf32>
    tpu.vector_store %arg10[%c0_23, %c0_24], %29 {strides = array<i32>} : memref<16x128xf32, #tpu.memory_space<vmem>>, vector<16x128xf32>,
    return
  }
  func.func @transform_0(%arg0: i32) -> (i32, i32) {
    %c0_i32 = arith.constant 0 : i32
    %c0_i32_0 = arith.constant 0 : i32
    return %c0_i32, %arg0 : i32, i32
  }
  func.func @transform_1(%arg0: i32) -> (i32, i32) {
    %c0_i32 = arith.constant 0 : i32
    %c0_i32_0 = arith.constant 0 : i32
    %c0_i32_1 = arith.constant 0 : i32
    return %c0_i32, %c0_i32_0 : i32, i32
  }
  func.func @transform_2(%arg0: i32) -> (i32, i32) {
    %c0_i32 = arith.constant 0 : i32
    %c0_i32_0 = arith.constant 0 : i32
    %c0_i32_1 = arith.constant 0 : i32
    return %c0_i32, %c0_i32_0 : i32, i32
  }
  func.func @transform_3(%arg0: i32) -> (i32, i32) {
    %c0_i32 = arith.constant 0 : i32
    %c0_i32_0 = arith.constant 0 : i32
    %c0_i32_1 = arith.constant 0 : i32
    return %c0_i32, %c0_i32_0 : i32, i32
  }
  func.func @transform_4(%arg0: i32) -> (i32, i32) {
    %c0_i32 = arith.constant 0 : i32
    %c0_i32_0 = arith.constant 0 : i32
    %c0_i32_1 = arith.constant 0 : i32
    return %c0_i32, %c0_i32_0 : i32, i32
  }
  func.func @transform_5(%arg0: i32) -> (i32, i32) {
    %c0_i32 = arith.constant 0 : i32
    %c0_i32_0 = arith.constant 0 : i32
    %c0_i32_1 = arith.constant 0 : i32
    return %c0_i32, %c0_i32_0 : i32, i32
  }
  func.func @transform_6(%arg0: i32) -> (i32, i32) {
    %c0_i32 = arith.constant 0 : i32
    %c0_i32_0 = arith.constant 0 : i32
    %c0_i32_1 = arith.constant 0 : i32
    return %c0_i32, %c0_i32_0 : i32, i32
  }
  func.func @transform_7(%arg0: i32) -> (i32, i32) {
    %c0_i32 = arith.constant 0 : i32
    %c0_i32_0 = arith.constant 0 : i32
    %c0_i32_1 = arith.constant 0 : i32
    return %c0_i32, %c0_i32_0 : i32, i32
  }
  func.func @transform_8(%arg0: i32) -> (i32, i32) {
    %c0_i32 = arith.constant 0 : i32
    %c0_i32_0 = arith.constant 0 : i32
    %c0_i32_1 = arith.constant 0 : i32
    return %c0_i32, %c0_i32_0 : i32, i32
  }
  func.func @transform_9(%arg0: i32) -> (i32, i32) {
    %c0_i32 = arith.constant 0 : i32
    %c0_i32_0 = arith.constant 0 : i32
    return %c0_i32, %arg0 : i32, i32
  }
}

</mosaic_0001>

<bundles_post_ra>
// kernel: tpu_custom_call.1
= control target key start
LH: loop header
LB: loop body
LE: loop exit
PB: predicated region body
PF: predicated region fallthrough
CT: control target
= control target key end

     0   :  { %v337_v3 = vmov 0   ;;  %vm80_vm0 = vcmask 130048   ;;  %s450_s0 = inlined_call_operand.vmem [shape: bf16[16,128], index: 0, kind: input, shape index: {}]   ;;  %s451_s1 = inlined_call_operand.vmem [shape: bf16[32,16], index: 1, kind: input, shape index: {}]   ;;  %s452_s2 = inlined_call_operand.vmem [shape: f32[32,1], index: 2, kind: input, shape index: {}]   ;;  %s453_s3 = inlined_call_operand.vmem [shape: bf16[8,32], index: 3, kind: input, shape index: {}]   ;;  %s454_s4 = inlined_call_operand.vmem [shape: f32[8,1], index: 4, kind: input, shape index: {}]   ;;  %s455_s5 = inlined_call_operand.vmem [shape: bf16[32,8], index: 5, kind: input, shape index: {}]   ;;  %s456_s6 = inlined_call_operand.vmem [shape: f32[32,1], index: 6, kind: input, shape index: {}]   ;;  %s457_s7 = inlined_call_operand.vmem [shape: bf16[16,32], index: 7, kind: input, shape index: {}]   ;;  %s458_s8 = inlined_call_operand.vmem [shape: f32[16,1], index: 8, kind: input, shape index: {}]   ;;  %s459_s9 = inlined_call_operand.hbm [shape: f32[16,128], index: 9, kind: output, shape index: {}]  }
   0x1   :  { %v298_v0 = vld [vmem:[%s450_s0] sm:$0xff]  ;;  %v42_v1 = vld [vmem:[%s452_s2 + $0x10] sm:$0xff]  ;;  %308 = vset.pattern.permute.xlu0 %v337_v3  ;;  %309 = vset.pattern.permute.xlu1 %v337_v3 }
   0x2   :  { %v299_v2 = vld [vmem:[%s451_s1] sm:$0xff]  ;;  %94 = vmatpush.bf16.msra.mxu0 %v298_v0  ;;  %56 = vperm.xlu0 %308, %v42_v1  }
   0x3   :  { %v40_v4 = vld [vmem:[%s452_s2] sm:$0xff]  ;;  %310 = vset.pattern.permute.xlu2 %v337_v3 }
   0x4   :  { %46 = vperm.xlu1 %309, %v40_v4  }
   0x5   :  { %14 = vsyncpa [#allocation3], 0  ;;  %280 = vmatmul.msk.bf16.vlgmr.msra.gmra.mxu0 %vm80_vm0, %v299_v2  ;;  %v43_v5 = vld [vmem:[%s452_s2 + $0x18] sm:$0xff]  ;;  %v41_v6 = vld [vmem:[%s452_s2 + $0x8] sm:$0xff]  ;;  %vm119_vm1 = vcmask 261120   ;;  %vm183_vm2 = vcmask 1043456  }
   0x6   :  { %v145_v7 = vld [vmem:[%s456_s6 + $0x18] sm:$0xff]  ;;  %v142_v8 = vld [vmem:[%s456_s6] sm:$0xff]  ;;  %v300_v9 = vld [vmem:[%s451_s1 + $0x8] sm:$0xff]  ;;  %vm176_vm3 = vcmask 64512   ;;  %s338_s16 = smov [#allocation2]   ;;  %s256_s19 = sshll.u32 %s459_s9, 4  ;;  %s257_s19 = int_to_ptr.hbm [resolvable:$true] %s256_s19 }
   0x7   :  { %v214_v10 = vld [vmem:[%s458_s8] sm:$0xff]  ;;  %v215_v11 = vld [vmem:[%s458_s8 + $0x8] sm:$0xff]  ;;  %v144_v15 = vld [vmem:[%s456_s6 + $0x10] sm:$0xff]  ;;  %s254_s0 = sshll.u32 %s338_s16, 4  ;;  %s340_s20 = smov 8   ;;  %s255_s0 = int_to_ptr.vmem [resolvable:$true] %s254_s0 }
   0x8   :  { %v113_v13 = vld [vmem:[%s454_s4] sm:$0xff]  ;;  %v143_v19 = vld [vmem:[%s456_s6 + $0x8] sm:$0xff] }
   0x9   :  { %116 = vperm.xlu2 %310, %v113_v13   ;;  %v112_v33 = vld [vmem:[%s453_s3] sm:$0xf]  ;;  %v302_v42 = vld [vmem:[%s455_s5 + $0x8] sm:$0xff] }
   0xa   :  { %61 = vperm.xlu0 %308, %v43_v5   ;;  %v301_v40 = vld [vmem:[%s455_s5] sm:$0xff] }
   0xb   :  { %v303_v61 = vld [vmem:[%s457_s7] sm:$0xff]  ;;  %s339_s7 = smov 128  }
   0xc   :  { %51 = vperm.xlu1 %309, %v41_v6  }
  0x11   :  { %158 = vperm.xlu2 %310, %v144_v15  }
  0x12   :  { %163 = vperm.xlu0 %308, %v145_v7  }
  0x14   :  { %148 = vperm.xlu1 %309, %v142_v8  }
  0x15   :  { %281 = vmatmul.msk.bf16.gmra.mxu0 %vm80_vm0, %v300_v9 }
  0x19   :  { %153 = vperm.xlu2 %310, %v143_v19  }
  0x1a   :  { %218 = vperm.xlu0 %308, %v214_v10  }
  0x1c   :  { %223 = vperm.xlu1 %309, %v215_v11  }
  0x63   :  { %v117_v34 = vpop.permute.xlu2 %116 }
  0x6b   :  { %v159_v45 = vpop.permute.xlu2 %158 }
  0x73   :  { %v154_v49 = vpop.permute.xlu2 %153 }
  0x74   :  { %v57_v16 = vpop.permute.xlu0 %56 }
  0x76   :  { %v47_v17 = vpop.permute.xlu1 %46 }
  0x7c   :  { %v62_v20 = vpop.permute.xlu0 %61 }
  0x7e   :  { %v52_v22 = vpop.permute.xlu1 %51 }
  0x82   :  { %v96_v12 = vpop.f32.mrf.mxu0 }
  0x83   :  { %v97_v26 = vadd.f32 %v96_v12, %v47_v17 }
  0x84   :  { %v164_v47 = vpop.permute.xlu0 %163 }
  0x85   :  { %v106_v31 = vmax.f32 %v97_v26, 0.0 }
  0x86   :  { %v149_v53 = vpop.permute.xlu1 %148 }
  0x8a   :  { %v98_v14 = vpop.f32.mrf.mxu0 }
  0x8b   :  { %v99_v24 = vadd.f32 %v98_v14, %v52_v22 }
  0x8c   :  { %v219_v62 = vpop.permute.xlu0 %218 }
  0x8d   :  { %v107_v29 = vmax.f32 %v99_v24, 0.0 }
  0x8e   :  { %v224_v1 = vpop.permute.xlu1 %223 }
  0x8f   :  { %v110_v32 = vpack.c.bf16 %v107_v29, %v106_v31 }
  0x92   :  { %v101_v18 = vpop.f32.mrf.mxu0 }
  0x93   :  { %v102_v21 = vadd.f32 %v101_v18, %v57_v16 }
  0x95   :  { %v108_v27 = vmax.f32 %v102_v21, 0.0 }
  0x9a   :  { %v103_v23 = vpop.f32.mrf.mxu0 }
  0x9b   :  { %v104_v25 = vadd.f32 %v103_v23, %v62_v20 }
  0x9d   :  { %v109_v28 = vmax.f32 %v104_v25, 0.0 }
  0x9f   :  { %v111_v30 = vpack.c.bf16 %v109_v28, %v108_v27 }
  0xa1   :  { %129 = vmatpush.bf16.msra.mxu1 %v111_v30 }
  0xa5   :  { %130 = vmatpush.bf16.msra.mxu1 %v110_v32 }
  0xa8   :  { %282 = vmatmul.msk.bf16.vlgmr.msra.gmra.mxu1 %vm119_vm1, %v112_v33 }
 0x125   :  { %v132_v35 = vpop.f32.mrf.mxu1 }
 0x126   :  { %v133_v36 = vadd.f32 %v132_v35, %v117_v34 }
 0x128   :  { %v136_v37 = vmax.f32 %v133_v36, 0.0 }
 0x12a   :  { %v137_v38 = vpack.c.bf16 %v136_v37, %v136_v37 }
 0x12c   :  { %v185_v39 = vsel %vm183_vm2, %v137_v38, 0 }
 0x12d   :  { %v134_v41 = vpop.f32.mrf.mxu1  ;;  %194 = vmatpush.bf16.msra.mxu2 %v185_v39 }
 0x130   :  { %291 = vmatmul.msk.bf16.vlgmr.msra.gmra.mxu2 %vm176_vm3, %v301_v40 }
 0x140   :  { %292 = vmatmul.msk.bf16.gmra.mxu2 %vm176_vm3, %v302_v42 }
 0x1b3   :  { %v196_v43 = vpop.f32.mrf.mxu2 }
 0x1b4   :  { %v197_v54 = vadd.f32 %v196_v43, %v149_v53 }
 0x1b6   :  { %v206_v59 = vmax.f32 %v197_v54, 0.0 }
 0x1bb   :  { %v198_v44 = vpop.f32.mrf.mxu2 }
 0x1bc   :  { %v199_v51 = vadd.f32 %v198_v44, %v154_v49 }
 0x1be   :  { %v207_v57 = vmax.f32 %v199_v51, 0.0 }
 0x1c0   :  { %v210_v60 = vpack.c.bf16 %v207_v57, %v206_v59 }
 0x1c3   :  { %v201_v46 = vpop.f32.mrf.mxu2 }
 0x1c4   :  { %v202_v48 = vadd.f32 %v201_v46, %v159_v45 }
 0x1c6   :  { %v208_v55 = vmax.f32 %v202_v48, 0.0 }
 0x1cb   :  { %v203_v50 = vpop.f32.mrf.mxu2 }
 0x1cc   :  { %v204_v52 = vadd.f32 %v203_v50, %v164_v47 }
 0x1ce   :  { %v209_v56 = vmax.f32 %v204_v52, 0.0 }
 0x1d0   :  { %v211_v58 = vpack.c.bf16 %v209_v56, %v208_v55 }
 0x1d2   :  { %240 = vmatpush.bf16.msra.mxu3 %v211_v58 }
 0x1d6   :  { %241 = vmatpush.bf16.msra.mxu3 %v210_v60 }
 0x1d9   :  { %297 = vmatmul.msk.bf16.vlgmr.msra.gmra.mxu3 %vm119_vm1, %v303_v61 }
 0x25c   :  { %v243_v63 = vpop.f32.mrf.mxu3 }
 0x25d   :  { %v244_v0 = vadd.f32 %v243_v63, %v219_v62 }
 0x25f   :  { %248 = vst [vmem:[#allocation2] sm:$0xff] %v244_v0 }
 0x264   :  { %v245_v2 = vpop.f32.mrf.mxu3 }
 0x265   :  { %v246_v3 = vadd.f32 %v245_v2, %v224_v1 }
 0x267   :  { %249 = vst [vmem:[#allocation2 + $0x8] sm:$0xff] %v246_v3 }
 0x268   :  { %262 = dma.vmem_to_hbm [thread:$0]  %s255_s0, 256, %s257_s19, [#allocation3], %s339_s7, %s339_s7, %s340_s20  }
 0x269   :  { %335 = dma.done.wait [#allocation3], 256  }
 0x26a   :  { %336 = vsyncadd [#allocation3], 4294967040 }
 0x26b   :  { %267 = vsyncpa [#allocation3], 1 }

</bundles_post_ra>
